<compile_context>
chip_gen: v7x
topology: tpu7x:2x2x1
jax: 0.10.0
libtpu: 0.0.40
codegen_flags: <defaults>
</compile_context>

<pallas_src>
import functools

import jax
import jax.numpy as jnp
from jax import lax
from jax.experimental import pallas as pl
from jax.experimental.pallas import tpu as pltpu

LANES = 128            # vreg lane width
SUBLANES = 8           # vreg sublane count (f32)
MAX_BLOCK_ROWS = 2048  # rows per grid step (2048*128*4B = 1 MiB per stream per step)
NUM_CORES = 2          # v7x has 2 TensorCores; harmless (sequential) on v5e/v6e


def _bce_dice_kernel(o_ref, l_ref, out_ref, acc_ref, *,
                     n_elems, block_rows, steps_per_core, smooth, gamma,
                     pos_coef, eps, needs_mask, binary_labels):
    """Grid = (core, step).  acc_ref is (3, 8, LANES) per-core running partials:
         [0] sum of outputs*labels          (dice intersection)
         [1] sum of outputs + labels        (dice union term)
         [2] sum of focal_summand - bce_summand  (scalar term = sum/n)
       out_ref is the (1, 3, LANES) per-core lane-wise partial-sum block; the final
       cross-lane/cross-core reduce + dice formula run in the JAX wrapper.
    """
    c = pl.program_id(0)
    i = pl.program_id(1)
    nsteps = pl.num_programs(1)

    @pl.when(i == 0)
    def _():
        acc_ref[...] = jnp.zeros_like(acc_ref)

    o = o_ref[...].astype(jnp.float32)
    l = l_ref[...].astype(jnp.float32)

    oc = jnp.clip(o, eps, 1.0 - eps)
    one_m_oc = 1.0 - oc
    log_oc = jnp.log(oc)
    log_1m_oc = jnp.log(one_m_oc)

    # Dice uses the *unclipped* outputs, exactly like the PyTorch reference.
    inter_c = o * l
    union_c = o + l

    # weighted_bce_loss_2d summand (pre-negation), strength-reduced:
    #   l*log(oc)*pos + (1-l)*log(1-oc) == log(1-oc) + l*(pos*log(oc) - log(1-oc))
    bce_c = log_1m_oc + l * (pos_coef * log_oc - log_1m_oc)

    # my_focal_loss summand: -p^gamma * log(p); p == (1-oc) + l*(2*oc - 1)
    p = one_m_oc + l * (2.0 * oc - 1.0)
    if binary_labels:
        # Exact only for hard {0,1} labels: blend the two logs we already have
        # (saves one EUP transcendental per element).
        log_p = log_1m_oc + l * (log_oc - log_1m_oc)
    else:
        log_p = jnp.log(p)
    if gamma == 2.0:
        p_pow = p * p
    elif gamma == 1.0:
        p_pow = p
    else:
        p_pow = jnp.exp(gamma * log_p)   # reuse log_p; avoid jnp.power's extra log
    focal_c = -p_pow * log_p

    # total = bce + 2*dice + focal, with bce = -bce_sum/n and focal = focal_sum/n
    # -> scalar term is (focal_sum - bce_sum)/n, so accumulate the difference.
    scalar_c = focal_c - bce_c

    r8 = block_rows // SUBLANES   # block_rows is always a multiple of 8

    def accumulate(ic, uc, sc):
        # (block_rows,128) -> (r8,8,128) respects the (8,128) vreg tiling; the sum
        # over axis 0 is pure vreg-wise VPU adds, and only an (8,128) tile hits the
        # accumulator VMEM each step.
        acc_ref[0] += jnp.sum(ic.reshape(r8, SUBLANES, LANES), axis=0)
        acc_ref[1] += jnp.sum(uc.reshape(r8, SUBLANES, LANES), axis=0)
        acc_ref[2] += jnp.sum(sc.reshape(r8, SUBLANES, LANES), axis=0)

    if needs_mask:
        blk_idx = c * steps_per_core + i          # global (unclamped) block index
        full_rows = n_elems // LANES              # fully-valid rows
        rem = n_elems % LANES                     # valid lanes in the boundary row
        # Row-granularity comparisons only: no int32 overflow for huge n.
        is_tail = (blk_idx + 1) * block_rows > full_rows

        @pl.when(jnp.logical_not(is_tail))
        def _():  # fast path: every element of the block is valid
            accumulate(inter_c, union_c, scalar_c)

        @pl.when(is_tail)
        def _():  # ragged/OOB block: lane-select away pad zeros and garbage rows
            row_ids = lax.broadcasted_iota(jnp.int32, (block_rows, LANES), 0)
            col_ids = lax.broadcasted_iota(jnp.int32, (block_rows, LANES), 1)
            grow = blk_idx * block_rows + row_ids
            valid = grow < full_rows
            if rem:
                valid = jnp.logical_or(
                    valid, jnp.logical_and(grow == full_rows, col_ids < rem))
            zero = jnp.zeros_like(inter_c)
            accumulate(jnp.where(valid, inter_c, zero),
                       jnp.where(valid, union_c, zero),
                       jnp.where(valid, scalar_c, zero))
    else:
        accumulate(inter_c, union_c, scalar_c)

    @pl.when(i == nsteps - 1)
    def _():
        # Per-core lane-wise partial sums (cross-sublane reduce of an (8,128) tile);
        # the cheap cross-lane/cross-core reduce happens in the wrapper.
        out_ref[0, 0:1, :] = jnp.sum(acc_ref[0], axis=0, keepdims=True)
        out_ref[0, 1:2, :] = jnp.sum(acc_ref[1], axis=0, keepdims=True)
        out_ref[0, 2:3, :] = jnp.sum(acc_ref[2], axis=0, keepdims=True)


def bce_dice_loss(outputs, labels, smooth=1.0, gamma=2.0, pos_coef=10.0, eps=1e-7,
                  assume_binary_labels=False):
    """Pallas implementation of BceDiceLoss.forward(outputs, labels)."""
    o = outputs.reshape(-1)           # keep native dtype; cast happens in-kernel
    l = labels.reshape(-1)
    n = int(o.shape[0])

    # Pad the flat length to a multiple of 8*128 so the 2-D row count is a multiple
    # of the sublane count (needed for the (r8,8,128) in-kernel partial reduce).
    # For typical image batches n is already tile-aligned and this is free.
    tile_elems = SUBLANES * LANES
    pad = (-n) % tile_elems
    if pad:
        o = jnp.pad(o, (0, pad))
        l = jnp.pad(l, (0, pad))
    rows = (n + pad) // LANES                       # multiple of 8
    o2 = o.reshape(rows, LANES)
    l2 = l.reshape(rows, LANES)

    block_rows = min(rows, MAX_BLOCK_ROWS)          # multiple of 8
    total_blocks = (rows + block_rows - 1) // block_rows
    num_cores = NUM_CORES if total_blocks >= NUM_CORES else 1
    steps_per_core = (total_blocks + num_cores - 1) // num_cores
    # Any padded-lane, OOB-row, or clamped-duplicate block elements to mask out?
    needs_mask = num_cores * steps_per_core * block_rows * LANES > n

    kernel = functools.partial(
        _bce_dice_kernel,
        n_elems=n, block_rows=block_rows, steps_per_core=steps_per_core,
        smooth=float(smooth), gamma=float(gamma), pos_coef=float(pos_coef),
        eps=float(eps), needs_mask=needs_mask,
        binary_labels=bool(assume_binary_labels))

    def in_map(c, i):
        # Clamp so a core's trailing (fully out-of-range) step re-reads the last real
        # block instead of issuing an out-of-bounds DMA; its contribution is fully
        # masked in-kernel because the mask uses the *unclamped* block index.
        return (jnp.minimum(c * steps_per_core + i, total_blocks - 1), 0)

    blk = pl.BlockSpec((block_rows, LANES), in_map)

    partials = pl.pallas_call(
        kernel,
        out_shape=jax.ShapeDtypeStruct((num_cores, 3, LANES), jnp.float32),
        grid_spec=pltpu.PrefetchScalarGridSpec(
            num_scalar_prefetch=0,
            grid=(num_cores, steps_per_core),
            in_specs=[blk, blk],
            out_specs=pl.BlockSpec((1, 3, LANES), lambda c, i: (c, 0, 0)),
            scratch_shapes=[pltpu.VMEM((3, SUBLANES, LANES), jnp.float32)],
        ),
        compiler_params=pltpu.CompilerParams(
            dimension_semantics=("parallel", "arbitrary"),
            vmem_limit_bytes=32 * 1024 * 1024),
    )(o2, l2)

    # Tiny finalization in plain JAX (cross-core + cross-lane reduce of (cores,3,128)).
    inter = jnp.sum(partials[:, 0, :])
    union = jnp.sum(partials[:, 1, :])
    scal = jnp.sum(partials[:, 2, :])
    dice = 1.0 - (2.0 * inter + smooth) / (union + smooth)
    return scal / jnp.float32(n) + 2.0 * dice


def _reference_loss(outputs, labels, smooth=1.0, gamma=2.0, pos_coef=10.0, eps=1e-7):
    """Pure-JAX reference mirroring the PyTorch code (for verification only)."""
    o = outputs.reshape(-1).astype(jnp.float32)
    l = labels.reshape(-1).astype(jnp.float32)
    oc = jnp.clip(o, eps, 1.0 - eps)
    bce = -jnp.mean(l * jnp.log(oc) * pos_coef + (1.0 - l) * jnp.log(1.0 - oc))
    inter = jnp.sum(o * l)
    union = jnp.sum(o) + jnp.sum(l) + smooth
    dice = 1.0 - (2.0 * inter + smooth) / union
    p = oc * l + (1.0 - oc) * (1.0 - l)
    focal = jnp.mean(-(p ** gamma) * jnp.log(p))
    return bce + 2.0 * dice + focal


if __name__ == "__main__":
    key = jax.random.PRNGKey(0)

    test_shapes = [
        (2, 4, 16, 16),     # tile-aligned, single block, single core, no masking
        (3, 5, 7, 11),      # ragged element count -> pad + in-kernel tail mask
        (1, 1, 520, 128),   # single block, no masking, larger single-core case
        (2, 3, 512, 160),   # 2 blocks -> 2-core split, ragged second block
        (1, 1, 1040, 640),  # 3 blocks -> 2-core split + clamped duplicate block
    ]

    for t, shape in enumerate(test_shapes):
        k1, k2 = jax.random.split(jax.random.fold_in(key, t))
        outputs = jax.nn.sigmoid(jax.random.normal(k1, shape, dtype=jnp.float32))
        labels = (jax.random.uniform(k2, shape) < 0.3).astype(jnp.float32)

        loss = jax.block_until_ready(bce_dice_loss(outputs, labels))
        ref = jax.block_until_ready(_reference_loss(outputs, labels))
        assert jnp.allclose(loss, ref, rtol=1e-4, atol=1e-5), (shape, loss, ref)

        if t == 0:
            # Binary-label fast path (fewer transcendentals); labels here are {0,1}.
            loss_bin = jax.block_until_ready(
                bce_dice_loss(outputs, labels, assume_binary_labels=True))
            assert jnp.allclose(loss_bin, ref, rtol=1e-4, atol=1e-5), (loss_bin, ref)

    print("KERNEL_OK")
</pallas_src>

<mosaic_0001>
module attributes {stable_mosaic.version = 11 : i64} {
  func.func @_bce_dice_kernel(%arg0: i32, %arg1: i32, %arg2: memref<16x128xf32, #tpu.memory_space<vmem>>, %arg3: memref<16x128xf32, #tpu.memory_space<vmem>>, %arg4: memref<1x3x128xf32, #tpu.memory_space<vmem>>, %arg5: memref<3x8x128xf32, #tpu.memory_space<vmem>>) attributes {dimension_semantics = [#tpu.dimension_semantics<parallel>, #tpu.dimension_semantics<arbitrary>], iteration_bounds = array<i64: 1, 1>, scalar_prefetch = 0 : i64, scratch_operands = 1 : i64, tpu.core_type = #tpu.core_type<tc>, window_params = [{transform_indices = @transform_0, window_bounds = array<i64: 16, 128>}, {transform_indices = @transform_1, window_bounds = array<i64: 16, 128>}, {transform_indices = @transform_2, window_bounds = array<i64: 1, 3, 128>}]} {
    %c0_i32 = arith.constant 0 : i32
    %0 = arith.cmpi eq, %arg1, %c0_i32 : i32
    %1 = arith.extui %0 : i1 to i32
    %c0_i32_0 = arith.constant 0 : i32
    %2 = arith.cmpi ne, %1, %c0_i32_0 : i32
    scf.if %2 {
      %cst_31 = arith.constant 0.000000e+00 : f32
      %59 = vector.broadcast %cst_31 : f32 to vector<3x8x128xf32>
      %c0_32 = arith.constant 0 : index
      %c0_33 = arith.constant 0 : index
      %c0_34 = arith.constant 0 : index
      %60 = vector.load %arg5[%c0_32, %c0_33, %c0_34] : memref<3x8x128xf32, #tpu.memory_space<vmem>>, vector<3x8x128xf32>
      tpu.vector_store %arg5[%c0_32, %c0_33, %c0_34], %59 {strides = array<i32>} : memref<3x8x128xf32, #tpu.memory_space<vmem>>, vector<3x8x128xf32>,
    } else {
    }
    %c0 = arith.constant 0 : index
    %c0_1 = arith.constant 0 : index
    %3 = vector.load %arg2[%c0, %c0_1] : memref<16x128xf32, #tpu.memory_space<vmem>>, vector<16x128xf32>
    %c0_2 = arith.constant 0 : index
    %c0_3 = arith.constant 0 : index
    %4 = vector.load %arg3[%c0_2, %c0_3] : memref<16x128xf32, #tpu.memory_space<vmem>>, vector<16x128xf32>
    %cst = arith.constant 1.000000e-07 : f32
    %cst_4 = arith.constant 0.99999988 : f32
    %5 = vector.broadcast %cst : f32 to vector<16x128xf32>
    %6 = arith.maximumf %5, %3 : vector<16x128xf32>
    %7 = vector.broadcast %cst_4 : f32 to vector<16x128xf32>
    %8 = arith.minimumf %7, %6 : vector<16x128xf32>
    %cst_5 = arith.constant 1.000000e+00 : f32
    %9 = vector.broadcast %cst_5 : f32 to vector<16x128xf32>
    %10 = arith.subf %9, %8 : vector<16x128xf32>
    %11 = math.log %8 : vector<16x128xf32>
    %12 = math.log %10 : vector<16x128xf32>
    %13 = arith.mulf %3, %4 : vector<16x128xf32>
    %14 = arith.addf %3, %4 : vector<16x128xf32>
    %cst_6 = arith.constant 1.000000e+01 : f32
    %15 = vector.broadcast %cst_6 : f32 to vector<16x128xf32>
    %16 = arith.mulf %15, %11 : vector<16x128xf32>
    %17 = arith.subf %16, %12 : vector<16x128xf32>
    %18 = arith.mulf %4, %17 : vector<16x128xf32>
    %19 = arith.addf %12, %18 : vector<16x128xf32>
    %cst_7 = arith.constant 2.000000e+00 : f32
    %20 = vector.broadcast %cst_7 : f32 to vector<16x128xf32>
    %21 = arith.mulf %20, %8 : vector<16x128xf32>
    %cst_8 = arith.constant 1.000000e+00 : f32
    %22 = vector.broadcast %cst_8 : f32 to vector<16x128xf32>
    %23 = arith.subf %21, %22 : vector<16x128xf32>
    %24 = arith.mulf %4, %23 : vector<16x128xf32>
    %25 = arith.addf %10, %24 : vector<16x128xf32>
    %26 = math.log %25 : vector<16x128xf32>
    %27 = arith.mulf %25, %25 : vector<16x128xf32>
    %cst_9 = arith.constant 0.000000e+00 : f32
    %28 = vector.broadcast %cst_9 : f32 to vector<16x128xf32>
    %29 = arith.subf %28, %27 : vector<16x128xf32>
    %30 = arith.mulf %29, %26 : vector<16x128xf32>
    %31 = arith.subf %30, %19 : vector<16x128xf32>
    %c0_10 = arith.constant 0 : index
    %c0_11 = arith.constant 0 : index
    %c0_12 = arith.constant 0 : index
    %32 = vector.load %arg5[%c0_10, %c0_11, %c0_12] : memref<3x8x128xf32, #tpu.memory_space<vmem>>, vector<1x8x128xf32>
    %33 = vector.shape_cast %32 : vector<1x8x128xf32> to vector<8x128xf32>
    %34 = vector.shape_cast %13 : vector<16x128xf32> to vector<2x8x128xf32>
    %cst_13 = arith.constant dense<0.000000e+00> : vector<8x128xf32>
    %35 = vector.multi_reduction <add>, %34, %cst_13 [0] : vector<2x8x128xf32> to vector<8x128xf32>
    %36 = arith.addf %33, %35 : vector<8x128xf32>
    %c0_14 = arith.constant 0 : index
    %c0_15 = arith.constant 0 : index
    %c0_16 = arith.constant 0 : index
    %37 = vector.load %arg5[%c0_14, %c0_15, %c0_16] : memref<3x8x128xf32, #tpu.memory_space<vmem>>, vector<1x8x128xf32>
    %38 = vector.shape_cast %37 : vector<1x8x128xf32> to vector<8x128xf32>
    %39 = vector.shape_cast %36 : vector<8x128xf32> to vector<1x8x128xf32>
    tpu.vector_store %arg5[%c0_14, %c0_15, %c0_16], %39 {strides = array<i32>} : memref<3x8x128xf32, #tpu.memory_space<vmem>>, vector<1x8x128xf32>,
    %c1 = arith.constant 1 : index
    %c0_17 = arith.constant 0 : index
    %c0_18 = arith.constant 0 : index
    %40 = vector.load %arg5[%c1, %c0_17, %c0_18] : memref<3x8x128xf32, #tpu.memory_space<vmem>>, vector<1x8x128xf32>
    %41 = vector.shape_cast %40 : vector<1x8x128xf32> to vector<8x128xf32>
    %42 = vector.shape_cast %14 : vector<16x128xf32> to vector<2x8x128xf32>
    %cst_19 = arith.constant dense<0.000000e+00> : vector<8x128xf32>
    %43 = vector.multi_reduction <add>, %42, %cst_19 [0] : vector<2x8x128xf32> to vector<8x128xf32>
    %44 = arith.addf %41, %43 : vector<8x128xf32>
    %c1_20 = arith.constant 1 : index
    %c0_21 = arith.constant 0 : index
    %c0_22 = arith.constant 0 : index
    %45 = vector.load %arg5[%c1_20, %c0_21, %c0_22] : memref<3x8x128xf32, #tpu.memory_space<vmem>>, vector<1x8x128xf32>
    %46 = vector.shape_cast %45 : vector<1x8x128xf32> to vector<8x128xf32>
    %47 = vector.shape_cast %44 : vector<8x128xf32> to vector<1x8x128xf32>
    tpu.vector_store %arg5[%c1_20, %c0_21, %c0_22], %47 {strides = array<i32>} : memref<3x8x128xf32, #tpu.memory_space<vmem>>, vector<1x8x128xf32>,
    %c2 = arith.constant 2 : index
    %c0_23 = arith.constant 0 : index
    %c0_24 = arith.constant 0 : index
    %48 = vector.load %arg5[%c2, %c0_23, %c0_24] : memref<3x8x128xf32, #tpu.memory_space<vmem>>, vector<1x8x128xf32>
    %49 = vector.shape_cast %48 : vector<1x8x128xf32> to vector<8x128xf32>
    %50 = vector.shape_cast %31 : vector<16x128xf32> to vector<2x8x128xf32>
    %cst_25 = arith.constant dense<0.000000e+00> : vector<8x128xf32>
    %51 = vector.multi_reduction <add>, %50, %cst_25 [0] : vector<2x8x128xf32> to vector<8x128xf32>
    %52 = arith.addf %49, %51 : vector<8x128xf32>
    %c2_26 = arith.constant 2 : index
    %c0_27 = arith.constant 0 : index
    %c0_28 = arith.constant 0 : index
    %53 = vector.load %arg5[%c2_26, %c0_27, %c0_28] : memref<3x8x128xf32, #tpu.memory_space<vmem>>, vector<1x8x128xf32>
    %54 = vector.shape_cast %53 : vector<1x8x128xf32> to vector<8x128xf32>
    %55 = vector.shape_cast %52 : vector<8x128xf32> to vector<1x8x128xf32>
    tpu.vector_store %arg5[%c2_26, %c0_27, %c0_28], %55 {strides = array<i32>} : memref<3x8x128xf32, #tpu.memory_space<vmem>>, vector<1x8x128xf32>,
    %c0_i32_29 = arith.constant 0 : i32
    %56 = arith.cmpi eq, %arg1, %c0_i32_29 : i32
    %57 = arith.extui %56 : i1 to i32
    %c0_i32_30 = arith.constant 0 : i32
    %58 = arith.cmpi ne, %57, %c0_i32_30 : i32
    scf.if %58 {
      %c0_31 = arith.constant 0 : index
      %c0_32 = arith.constant 0 : index
      %c0_33 = arith.constant 0 : index
      %59 = vector.load %arg5[%c0_31, %c0_32, %c0_33] : memref<3x8x128xf32, #tpu.memory_space<vmem>>, vector<1x8x128xf32>
      %60 = vector.shape_cast %59 : vector<1x8x128xf32> to vector<8x128xf32>
      %cst_34 = arith.constant dense<0.000000e+00> : vector<128xf32>
      %61 = vector.multi_reduction <add>, %60, %cst_34 [0] : vector<8x128xf32> to vector<128xf32>
      %62 = vector.shape_cast %61 : vector<128xf32> to vector<1x128xf32>
      %c0_35 = arith.constant 0 : index
      %c0_36 = arith.constant 0 : index
      %c0_37 = arith.constant 0 : index
      %63 = vector.load %arg4[%c0_35, %c0_36, %c0_37] : memref<1x3x128xf32, #tpu.memory_space<vmem>>, vector<1x1x128xf32>
      %64 = vector.shape_cast %63 : vector<1x1x128xf32> to vector<1x128xf32>
      %65 = vector.shape_cast %62 : vector<1x128xf32> to vector<1x1x128xf32>
      tpu.vector_store %arg4[%c0_35, %c0_36, %c0_37], %65 {strides = array<i32>} : memref<1x3x128xf32, #tpu.memory_space<vmem>>, vector<1x1x128xf32>,
      %c1_38 = arith.constant 1 : index
      %c0_39 = arith.constant 0 : index
      %c0_40 = arith.constant 0 : index
      %66 = vector.load %arg5[%c1_38, %c0_39, %c0_40] : memref<3x8x128xf32, #tpu.memory_space<vmem>>, vector<1x8x128xf32>
      %67 = vector.shape_cast %66 : vector<1x8x128xf32> to vector<8x128xf32>
      %cst_41 = arith.constant dense<0.000000e+00> : vector<128xf32>
      %68 = vector.multi_reduction <add>, %67, %cst_41 [0] : vector<8x128xf32> to vector<128xf32>
      %69 = vector.shape_cast %68 : vector<128xf32> to vector<1x128xf32>
      %c0_42 = arith.constant 0 : index
      %c1_43 = arith.constant 1 : index
      %c0_44 = arith.constant 0 : index
      %70 = vector.load %arg4[%c0_42, %c1_43, %c0_44] : memref<1x3x128xf32, #tpu.memory_space<vmem>>, vector<1x1x128xf32>
      %71 = vector.shape_cast %70 : vector<1x1x128xf32> to vector<1x128xf32>
      %72 = vector.shape_cast %69 : vector<1x128xf32> to vector<1x1x128xf32>
      tpu.vector_store %arg4[%c0_42, %c1_43, %c0_44], %72 {strides = array<i32>} : memref<1x3x128xf32, #tpu.memory_space<vmem>>, vector<1x1x128xf32>,
      %c2_45 = arith.constant 2 : index
      %c0_46 = arith.constant 0 : index
      %c0_47 = arith.constant 0 : index
      %73 = vector.load %arg5[%c2_45, %c0_46, %c0_47] : memref<3x8x128xf32, #tpu.memory_space<vmem>>, vector<1x8x128xf32>
      %74 = vector.shape_cast %73 : vector<1x8x128xf32> to vector<8x128xf32>
      %cst_48 = arith.constant dense<0.000000e+00> : vector<128xf32>
      %75 = vector.multi_reduction <add>, %74, %cst_48 [0] : vector<8x128xf32> to vector<128xf32>
      %76 = vector.shape_cast %75 : vector<128xf32> to vector<1x128xf32>
      %c0_49 = arith.constant 0 : index
      %c2_50 = arith.constant 2 : index
      %c0_51 = arith.constant 0 : index
      %77 = vector.load %arg4[%c0_49, %c2_50, %c0_51] : memref<1x3x128xf32, #tpu.memory_space<vmem>>, vector<1x1x128xf32>
      %78 = vector.shape_cast %77 : vector<1x1x128xf32> to vector<1x128xf32>
      %79 = vector.shape_cast %76 : vector<1x128xf32> to vector<1x1x128xf32>
      tpu.vector_store %arg4[%c0_49, %c2_50, %c0_51], %79 {strides = array<i32>} : memref<1x3x128xf32, #tpu.memory_space<vmem>>, vector<1x1x128xf32>,
    } else {
    }
    return
  }
  func.func @transform_0(%arg0: i32, %arg1: i32) -> (i32, i32) {
    %c1_i32 = arith.constant 1 : i32
    %0 = arith.muli %arg0, %c1_i32 : i32
    %1 = arith.addi %0, %arg1 : i32
    %c0_i32 = arith.constant 0 : i32
    %2 = arith.minsi %1, %c0_i32 : i32
    %c0_i32_0 = arith.constant 0 : i32
    %c0_i32_1 = arith.constant 0 : i32
    return %2, %c0_i32_0 : i32, i32
  }
  func.func @transform_1(%arg0: i32, %arg1: i32) -> (i32, i32) {
    %c1_i32 = arith.constant 1 : i32
    %0 = arith.muli %arg0, %c1_i32 : i32
    %1 = arith.addi %0, %arg1 : i32
    %c0_i32 = arith.constant 0 : i32
    %2 = arith.minsi %1, %c0_i32 : i32
    %c0_i32_0 = arith.constant 0 : i32
    %c0_i32_1 = arith.constant 0 : i32
    return %2, %c0_i32_0 : i32, i32
  }
  func.func @transform_2(%arg0: i32, %arg1: i32) -> (i32, i32, i32) {
    %c0_i32 = arith.constant 0 : i32
    %c0_i32_0 = arith.constant 0 : i32
    %c0_i32_1 = arith.constant 0 : i32
    return %arg0, %c0_i32, %c0_i32_0 : i32, i32, i32
  }
}

</mosaic_0001>

<bundles_post_ra>
// kernel: tpu_custom_call.1
= control target key start
LH: loop header
LB: loop body
LE: loop exit
PB: predicated region body
PF: predicated region fallthrough
CT: control target
= control target key end

     0   :  { %7 = vsyncpa [#allocation4], 0  ;;  %s285_s0 = inlined_call_operand.hbm [shape: f32[16,128], index: 0, kind: input, shape index: {}]   ;;  %s286_s1 = inlined_call_operand.hbm [shape: f32[16,128], index: 1, kind: input, shape index: {}]   ;;  %s287_s2 = inlined_call_operand.vmem [shape: f32[1,3,128], index: 2, kind: output, shape index: {}]  }
   0x1   :  { %8 = vsyncpa [#allocation6], 0  ;;  %s233_s9 = smov [#allocation3]   ;;  %s185_s13 = scalar_lea.hbm %s285_s0, 256 }
   0x2   :  { %s20_s10 = sshll.u32 %s233_s9, 4  ;;  %p186_p0 = scmp.ne.s32.totalorder %s285_s0, %s185_s13  ;;  %s21_s10 = int_to_ptr.vmem [resolvable:$true] %s20_s10 }
   0x3   :  { %p189_p1 = scmp.lt.u32.totalorder %s185_s13, %s285_s0 }
   0x5   :  { %p191_p2 = pnand %p189_p1, %p186_p0 }
   0x7   :  { %194 = shalt.err (!%p191_p2)
}
   0x8   :  { %s195_s18 = scalar_lea.vmem %s21_s10, 256  ;;  %p200_p4 = scmp.lt.s32.totalorder %s21_s10, %s21_s10 }
   0x9   :  { %p196_p3 = scmp.ne.s32.totalorder %s21_s10, %s195_s18  ;;  %p201_p5 = scmp.lt.s32.totalorder %s195_s18, %s195_s18 }
   0xb   :  { %p202_p6 = por %p201_p5, %p200_p4 }
   0xd   :  { %p203_p7 = pnand %p202_p6, %p196_p3 }
   0xf   :  { %206 = shalt.err (!%p203_p7)
}
  0x10   :  { %s234_s19 = smov 128   ;;  %s235_s20 = smov 8  }
  0x11   :  { %26 = dma.hbm_to_vmem [thread:$0]  %s285_s0, 256, %s21_s10, [#allocation4], %s234_s19, %s234_s19, %s235_s20  }
  0x12   :  { %s236_s23 = smov [#allocation5]   ;;  %s207_s27 = scalar_lea.hbm %s286_s1, 256 }
  0x13   :  { %s38_s24 = sshll.u32 %s236_s23, 4  ;;  %p208_p8 = scmp.ne.s32.totalorder %s286_s1, %s207_s27  ;;  %s39_s24 = int_to_ptr.vmem [resolvable:$true] %s38_s24 }
  0x14   :  { %p211_p9 = scmp.lt.u32.totalorder %s207_s27, %s286_s1 }
  0x16   :  { %p213_p10 = pnand %p211_p9, %p208_p8 }
  0x18   :  { %216 = shalt.err (!%p213_p10)
}
  0x19   :  { %s217_s4 = scalar_lea.vmem %s39_s24, 256  ;;  %p222_p12 = scmp.lt.s32.totalorder %s39_s24, %s39_s24 }
  0x1a   :  { %p218_p11 = scmp.ne.s32.totalorder %s39_s24, %s217_s4  ;;  %p223_p13 = scmp.lt.s32.totalorder %s217_s4, %s217_s4 }
  0x1c   :  { %p224_p0 = por %p223_p13, %p222_p12 }
  0x1e   :  { %p225_p1 = pnand %p224_p0, %p218_p11 }
  0x20   :  { %228 = shalt.err (!%p225_p1)
}
  0x21   :  { %44 = dma.hbm_to_vmem [thread:$0]  %s286_s1, 256, %s39_s24, [#allocation6], %s234_s19, %s234_s19, %s235_s20  }
  0x22   :  { %229 = dma.done.wait [#allocation4], 256  }
  0x23   :  { %230 = vsyncadd [#allocation4], 4294967040 }
  0x24   :  { %231 = dma.done.wait [#allocation6], 256  }
  0x25   :  { %232 = vsyncadd [#allocation6], 4294967040  ;;  %v66_v0 = vld [vmem:[#allocation3] sm:$0xff]  ;;  %v67_v1 = vld [vmem:[#allocation3 + $0x8] sm:$0xff] }
  0x26   :  { %v68_v2 = vld [vmem:[#allocation5] sm:$0xff]  ;;  %v69_v3 = vld [vmem:[#allocation5 + $0x8] sm:$0xff]  ;;  %v70_v4 = vmax.f32 %v66_v0, 1e-07  ;;  %v71_v5 = vmax.f32 %v67_v1, 1e-07 }
  0x27   :  { %v84_v6 = vmul.f32 %v68_v2, %v66_v0  ;;  %v86_v7 = vadd.f32 %v68_v2, %v66_v0  ;;  %v85_v8 = vmul.f32 %v69_v3, %v67_v1  ;;  %v87_v9 = vadd.f32 %v69_v3, %v67_v1 }
  0x28   :  { %v72_v10 = vmin.f32 %v70_v4, 0.9999999  ;;  %v73_v11 = vmin.f32 %v71_v5, 0.9999999 }
  0x29   :  { %v117_v12 = vadd.f32 %v85_v8, %v84_v6  ;;  %v122_v13 = vadd.f32 %v87_v9, %v86_v7 }
  0x2a   :  { %173 = vlog2.f32 %v72_v10  ;;  %v96_v14 = vmul.f32 2.0, %v72_v10  ;;  %v97_v15 = vmul.f32 2.0, %v73_v11  ;;  %v74_v16 = vsub.f32 1.0, %v72_v10 }
  0x2b   :  { %175 = vlog2.f32 %v73_v11  ;;  %v134_v17 = vrot.slane %v117_v12, 4  ;;  %v142_v18 = vrot.slane %v122_v13, 4  ;;  %v75_v19 = vsub.f32 1.0, %v73_v11 }
  0x2c   :  { %v167_v20 = vadd.f32 -1.0, %v96_v14  ;;  %v168_v21 = vadd.f32 -1.0, %v97_v15  ;;  %177 = vlog2.f32 %v74_v16 }
  0x2d   :  { %v135_v22 = vadd.f32 %v134_v17, %v117_v12  ;;  %v143_v23 = vadd.f32 %v142_v18, %v122_v13  ;;  %179 = vlog2.f32 %v75_v19 }
  0x2e   :  { %v100_v24 = vmul.f32 %v167_v20, %v68_v2  ;;  %v101_v25 = vmul.f32 %v168_v21, %v69_v3 }
  0x2f   :  { %v136_v26 = vrot.slane %v135_v22, 2  ;;  %v144_v27 = vrot.slane %v143_v23, 2 }
  0x30   :  { %v102_v28 = vadd.f32 %v100_v24, %v74_v16  ;;  %v103_v29 = vadd.f32 %v101_v25, %v75_v19 }
  0x31   :  { %v137_v30 = vadd.f32 %v136_v26, %v135_v22  ;;  %v145_v31 = vadd.f32 %v144_v27, %v143_v23 }
  0x32   :  { %181 = vlog2.f32 %v102_v28  ;;  %v108_v44 = vmul.f32 %v102_v28, %v102_v28  ;;  %v109_v47 = vmul.f32 %v103_v29, %v103_v29 }
  0x33   :  { %v138_v32 = vrot.slane %v137_v30, 1  ;;  %v146_v33 = vrot.slane %v145_v31, 1  ;;  %183 = vlog2.f32 %v103_v29 }
  0x34   :  { %v174_v34 = vpop.eup %173  ;;  %v110_v51 = vsub.f32 0.0, %v108_v44  ;;  %v111_v54 = vsub.f32 0.0, %v109_v47 }
  0x35   :  { %v176_v35 = vpop.eup %175  ;;  %v139_v36 = vadd.f32 %v138_v32, %v137_v30  ;;  %v147_v37 = vadd.f32 %v146_v33, %v145_v31  ;;  %v77_v38 = vmul.f32 0.6931472, %v174_v34 }
  0x36   :  { %v178_v39 = vpop.eup %177  ;;  %v79_v40 = vmul.f32 0.6931472, %v176_v35 }
  0x37   :  { %v180_v41 = vpop.eup %179  ;;  %140 = vst [vmem:[%s287_s2] sm:$0x1] %v139_v36  ;;  %148 = vst [vmem:[%s287_s2 + $0x1] sm:$0x1] %v147_v37  ;;  %v81_v42 = vmul.f32 0.6931472, %v178_v39  ;;  %v88_v43 = vmul.f32 10.0, %v77_v38 }
  0x38   :  { %v83_v45 = vmul.f32 0.6931472, %v180_v41  ;;  %v89_v46 = vmul.f32 10.0, %v79_v40 }
  0x39   :  { %v90_v48 = vsub.f32 %v88_v43, %v81_v42 }
  0x3a   :  { %v91_v49 = vsub.f32 %v89_v46, %v83_v45 }
  0x3b   :  { %v92_v50 = vmul.f32 %v90_v48, %v68_v2 }
  0x3c   :  { %v182_v52 = vpop.eup %181  ;;  %v93_v53 = vmul.f32 %v91_v49, %v69_v3 }
  0x3d   :  { %v184_v55 = vpop.eup %183  ;;  %v94_v56 = vadd.f32 %v92_v50, %v81_v42  ;;  %v105_v57 = vmul.f32 0.6931472, %v182_v52 }
  0x3e   :  { %v95_v58 = vadd.f32 %v93_v53, %v83_v45  ;;  %v107_v59 = vmul.f32 0.6931472, %v184_v55 }
  0x3f   :  { %v112_v60 = vmul.f32 %v110_v51, %v105_v57 }
  0x40   :  { %v113_v61 = vmul.f32 %v111_v54, %v107_v59 }
  0x41   :  { %v114_v62 = vsub.f32 %v112_v60, %v94_v56 }
  0x42   :  { %v115_v63 = vsub.f32 %v113_v61, %v95_v58 }
  0x44   :  { %v127_v0 = vadd.f32 %v115_v63, %v114_v62 }
  0x46   :  { %v150_v1 = vrot.slane %v127_v0, 4 }
  0x48   :  { %v151_v4 = vadd.f32 %v150_v1, %v127_v0 }
  0x4a   :  { %v152_v5 = vrot.slane %v151_v4, 2 }
  0x4c   :  { %v153_v6 = vadd.f32 %v152_v5, %v151_v4 }
  0x4e   :  { %v154_v7 = vrot.slane %v153_v6, 1 }
  0x50   :  { %v155_v2 = vadd.f32 %v154_v7, %v153_v6 }
  0x52   :  { %156 = vst [vmem:[%s287_s2 + $0x2] sm:$0x1] %v155_v2 }
  0x53   :  { %161 = vsyncpa [#allocation4], 1 }
  0x54   :  { %162 = vsyncpa [#allocation6], 1 }

</bundles_post_ra>
